<compile_context>
chip_gen: v5e
topology: v5e:2x2
jax: 0.10.0
libtpu: 0.0.40
codegen_flags: <defaults>
</compile_context>

<pallas_src>
import math
import jax
import jax.numpy as jnp
from jax.experimental import pallas as pl
from jax.experimental.pallas import tpu as pltpu


def _round_up(x, m):
    return ((x + m - 1) // m) * m


def dense_layer_kernel(x_ref, w1_ref, b1_ref, w2_ref, b2_ref, o_ref):
    # x_ref : (TB, IN_P)   bf16      w1_ref : (IN_P, HID_P)  bf16
    # b1_ref: (1, HID_P)   f32       w2_ref : (HID_P, N_OUT) f32
    # b2_ref: (1, N_OUT)   f32       o_ref  : (TB, N_OUT)    f32
    h = jnp.dot(x_ref[...], w1_ref[...], preferred_element_type=jnp.float32)
    h = jnp.maximum(h + b1_ref[...], 0.0)          # bias + ReLU in f32 (VPU)
    out = jnp.dot(h, w2_ref[...], preferred_element_type=jnp.float32) + b2_ref[...]
    o_ref[...] = out.astype(o_ref.dtype)


def prepare_params(w1, b1, w2, b2):
    """Pad / cast the layer parameters once (hoisted out of the hot path).

    w1 : (input, n_hidden)   b1 : (n_hidden,)
    w2 : (n_hidden, n_out)   b2 : (n_out,)
    """
    in_features, n_hidden = w1.shape
    n_out = w2.shape[1]
    in_p = _round_up(in_features, 128)
    hid_p = _round_up(n_hidden, 128)

    w1p = jnp.zeros((in_p, hid_p), jnp.bfloat16)
    w1p = w1p.at[:in_features, :n_hidden].set(w1.astype(jnp.bfloat16))
    b1p = jnp.zeros((1, hid_p), jnp.float32)
    b1p = b1p.at[0, :n_hidden].set(b1.astype(jnp.float32))
    w2p = jnp.zeros((hid_p, n_out), jnp.float32)
    w2p = w2p.at[:n_hidden, :].set(w2.astype(jnp.float32))
    b2p = b2.reshape(1, n_out).astype(jnp.float32)
    return dict(w1=w1p, b1=b1p, w2=w2p, b2=b2p, in_features=in_features)


def custom_dense_layer(x_nchw, params, *, tb_max=512):
    """CustomDenseLayer.forward: flatten -> linear -> relu -> linear2."""
    w1p, b1p, w2p, b2p = params["w1"], params["b1"], params["w2"], params["b2"]
    in_features = params["in_features"]
    in_p, hid_p = w1p.shape
    n_out = w2p.shape[1]

    B = x_nchw.shape[0]
    # Flatten (plain-JAX glue) — matches nn.Flatten() on NCHW input.
    x2d = x_nchw.reshape(B, -1)
    assert x2d.shape[1] == in_features

    # Batch tile: multiple of 8, capped.  VMEM/step:
    #   2 (dbl-buffer) * TB * IN_P * 2B (x, bf16)  +  resident weights (~100 KiB)
    # ≈ 0.4 MiB at TB=512 — safe on v5e/v6e/v7x scoped limits.
    tb = min(tb_max, _round_up(B, 8))
    bp = _round_up(B, tb)

    # Zero-pad batch + feature dims; cast the matmul operand to bf16.
    xp = jnp.zeros((bp, in_p), jnp.bfloat16)
    xp = xp.at[:B, :in_features].set(x2d.astype(jnp.bfloat16))

    grid = (bp // tb,)
    cost = pl.CostEstimate(
        flops=2 * bp * in_p * hid_p + 2 * bp * hid_p * n_out,
        transcendentals=0,
        bytes_accessed=(xp.size * 2 + w1p.size * 2
                        + (b1p.size + w2p.size + b2p.size) * 4
                        + bp * n_out * 4),
    )

    out = pl.pallas_call(
        dense_layer_kernel,
        out_shape=jax.ShapeDtypeStruct((bp, n_out), jnp.float32),
        grid=grid,
        in_specs=[
            pl.BlockSpec((tb, in_p), lambda i: (i, 0)),       # x tiles: pipelined
            pl.BlockSpec((in_p, hid_p), lambda i: (0, 0)),    # weights: resident
            pl.BlockSpec((1, hid_p), lambda i: (0, 0)),
            pl.BlockSpec((hid_p, n_out), lambda i: (0, 0)),
            pl.BlockSpec((1, n_out), lambda i: (0, 0)),
        ],
        out_specs=pl.BlockSpec((tb, n_out), lambda i: (i, 0)),
        compiler_params=pltpu.CompilerParams(
            dimension_semantics=("parallel",)),  # batch tiles shardable across TCs
        cost_estimate=cost,
    )(xp, w1p, b1p, w2p, b2p)
    return out[:B]


def init_linear_params(key, fan_in, fan_out):
    """PyTorch-style nn.Linear init: U(-1/sqrt(fan_in), +1/sqrt(fan_in))."""
    kw, kb = jax.random.split(key)
    bound = 1.0 / math.sqrt(fan_in)
    # Stored as (fan_in, fan_out) so the kernel does x @ W (== x @ W_pt.T).
    w = jax.random.uniform(kw, (fan_in, fan_out), jnp.float32, -bound, bound)
    b = jax.random.uniform(kb, (fan_out,), jnp.float32, -bound, bound)
    return w, b


def reference(x_nchw, w1, b1, w2, b2):
    """Pure-JAX reference mirroring the kernel's bf16-matmul / f32-accumulate math."""
    B = x_nchw.shape[0]
    x2d = x_nchw.reshape(B, -1)
    h = jnp.dot(x2d.astype(jnp.bfloat16), w1.astype(jnp.bfloat16),
                preferred_element_type=jnp.float32) + b1
    h = jnp.maximum(h, 0.0)
    return jnp.dot(h, w2) + b2


if __name__ == "__main__":
    # Module defaults: input=100, n_hidden=10, n_output=1 (opt.multi_task unset).
    B, C, H, W = 2, 4, 5, 5            # C*H*W = 100 = input features
    IN_FEATURES = C * H * W
    N_HIDDEN = 10
    N_OUT = 1

    key = jax.random.PRNGKey(0)
    kx, kxb, k1, k2 = jax.random.split(key, 4)

    x = jax.random.normal(kx, (B, C, H, W), jnp.float32)
    w1, b1 = init_linear_params(k1, IN_FEATURES, N_HIDDEN)
    w2, b2 = init_linear_params(k2, N_HIDDEN, N_OUT)

    params = prepare_params(w1, b1, w2, b2)

    # Small batch (single grid step, TB == padded B) — the module's toy shape.
    out = jax.block_until_ready(custom_dense_layer(x, params))
    ref = reference(x, w1, b1, w2, b2)
    assert out.shape == (B, N_OUT)
    assert jnp.allclose(out, ref, atol=2e-2, rtol=2e-2)

    # Moderately larger batch (grid > 1: exercises tiling, padding, slicing).
    B_BIG = 640
    x_big = jax.random.normal(kxb, (B_BIG, C, H, W), jnp.float32)
    out_big = jax.block_until_ready(custom_dense_layer(x_big, params))
    ref_big = reference(x_big, w1, b1, w2, b2)
    assert out_big.shape == (B_BIG, N_OUT)
    assert jnp.allclose(out_big, ref_big, atol=2e-2, rtol=2e-2)

    print("KERNEL_OK")
</pallas_src>

<mosaic_0001>
module attributes {stable_mosaic.version = 11 : i64} {
  func.func @dense_layer_kernel(%arg0: i32, %arg1: memref<8x128xbf16, #tpu.memory_space<vmem>>, %arg2: memref<128x128xbf16, #tpu.memory_space<vmem>>, %arg3: memref<1x128xf32, #tpu.memory_space<vmem>>, %arg4: memref<128x1xf32, #tpu.memory_space<vmem>>, %arg5: memref<1x1xf32, #tpu.memory_space<vmem>>, %arg6: memref<8x1xf32, #tpu.memory_space<vmem>>) attributes {dimension_semantics = [#tpu.dimension_semantics<parallel>], iteration_bounds = array<i64: 1>, scalar_prefetch = 0 : i64, scratch_operands = 0 : i64, tpu.core_type = #tpu.core_type<tc>, window_params = [{transform_indices = @transform_0, window_bounds = array<i64: 8, 128>}, {pipeline_mode = #tpu.pipeline_mode<synchronous>, transform_indices = @transform_1, window_bounds = array<i64: 128, 128>}, {pipeline_mode = #tpu.pipeline_mode<synchronous>, transform_indices = @transform_2, window_bounds = array<i64: 1, 128>}, {pipeline_mode = #tpu.pipeline_mode<synchronous>, transform_indices = @transform_3, window_bounds = array<i64: 128, 1>}, {pipeline_mode = #tpu.pipeline_mode<synchronous>, transform_indices = @transform_4, window_bounds = array<i64: 1, 1>}, {transform_indices = @transform_5, window_bounds = array<i64: 8, 1>}]} {
    %c0 = arith.constant 0 : index
    %c0_0 = arith.constant 0 : index
    %0 = vector.load %arg1[%c0, %c0_0] : memref<8x128xbf16, #tpu.memory_space<vmem>>, vector<8x128xbf16>
    %c0_1 = arith.constant 0 : index
    %c0_2 = arith.constant 0 : index
    %1 = vector.load %arg2[%c0_1, %c0_2] : memref<128x128xbf16, #tpu.memory_space<vmem>>, vector<128x128xbf16>
    %cst = arith.constant dense<0.000000e+00> : vector<8x128xf32>
    %2 = tpu.matmul %0, %1, %cst {dimension_numbers = #tpu.dot_dimension_numbers<[1], [0], [0], [1], [0, 0, 1, 1], [], []>} : vector<8x128xbf16>, vector<128x128xbf16>, vector<8x128xf32> -> vector<8x128xf32>
    %c0_3 = arith.constant 0 : index
    %c0_4 = arith.constant 0 : index
    %3 = vector.load %arg3[%c0_3, %c0_4] : memref<1x128xf32, #tpu.memory_space<vmem>>, vector<1x128xf32>
    %4 = vector.broadcast %3 : vector<1x128xf32> to vector<8x128xf32>
    %5 = arith.addf %2, %4 : vector<8x128xf32>
    %cst_5 = arith.constant 0.000000e+00 : f32
    %6 = vector.broadcast %cst_5 : f32 to vector<8x128xf32>
    %7 = arith.maximumf %5, %6 : vector<8x128xf32>
    %c0_6 = arith.constant 0 : index
    %c0_7 = arith.constant 0 : index
    %8 = vector.load %arg4[%c0_6, %c0_7] : memref<128x1xf32, #tpu.memory_space<vmem>>, vector<128x1xf32>
    %cst_8 = arith.constant dense<0.000000e+00> : vector<8x1xf32>
    %9 = tpu.matmul %7, %8, %cst_8 {dimension_numbers = #tpu.dot_dimension_numbers<[1], [0], [0], [1], [0, 0, 1, 1], [], []>} : vector<8x128xf32>, vector<128x1xf32>, vector<8x1xf32> -> vector<8x1xf32>
    %c0_9 = arith.constant 0 : index
    %c0_10 = arith.constant 0 : index
    %10 = vector.load %arg5[%c0_9, %c0_10] : memref<1x1xf32, #tpu.memory_space<vmem>>, vector<1x1xf32>
    %11 = vector.broadcast %10 : vector<1x1xf32> to vector<8x1xf32>
    %12 = arith.addf %9, %11 : vector<8x1xf32>
    %c0_11 = arith.constant 0 : index
    %c0_12 = arith.constant 0 : index
    %13 = vector.load %arg6[%c0_11, %c0_12] : memref<8x1xf32, #tpu.memory_space<vmem>>, vector<8x1xf32>
    tpu.vector_store %arg6[%c0_11, %c0_12], %12 {strides = array<i32>} : memref<8x1xf32, #tpu.memory_space<vmem>>, vector<8x1xf32>,
    return
  }
  func.func @transform_0(%arg0: i32) -> (i32, i32) {
    %c0_i32 = arith.constant 0 : i32
    %c0_i32_0 = arith.constant 0 : i32
    return %arg0, %c0_i32 : i32, i32
  }
  func.func @transform_1(%arg0: i32) -> (i32, i32) {
    %c0_i32 = arith.constant 0 : i32
    %c0_i32_0 = arith.constant 0 : i32
    %c0_i32_1 = arith.constant 0 : i32
    return %c0_i32, %c0_i32_0 : i32, i32
  }
  func.func @transform_2(%arg0: i32) -> (i32, i32) {
    %c0_i32 = arith.constant 0 : i32
    %c0_i32_0 = arith.constant 0 : i32
    %c0_i32_1 = arith.constant 0 : i32
    return %c0_i32, %c0_i32_0 : i32, i32
  }
  func.func @transform_3(%arg0: i32) -> (i32, i32) {
    %c0_i32 = arith.constant 0 : i32
    %c0_i32_0 = arith.constant 0 : i32
    %c0_i32_1 = arith.constant 0 : i32
    return %c0_i32, %c0_i32_0 : i32, i32
  }
  func.func @transform_4(%arg0: i32) -> (i32, i32) {
    %c0_i32 = arith.constant 0 : i32
    %c0_i32_0 = arith.constant 0 : i32
    %c0_i32_1 = arith.constant 0 : i32
    return %c0_i32, %c0_i32_0 : i32, i32
  }
  func.func @transform_5(%arg0: i32) -> (i32, i32) {
    %c0_i32 = arith.constant 0 : i32
    %c0_i32_0 = arith.constant 0 : i32
    return %arg0, %c0_i32 : i32, i32
  }
}

</mosaic_0001>

<bundles_post_ra>
// kernel: tpu_custom_call.1
= control target key start
LH: loop header
LB: loop body
LE: loop exit
PB: predicated region body
PF: predicated region fallthrough
CT: control target
= control target key end

     0   :  { %vm145_vm0 = vcmask 7168   ;;  %s307_s1 = inlined_call_operand.vmem [shape: bf16[128,128], index: 1, kind: input, shape index: {}]   ;;  %s308_s3 = inlined_call_operand.vmem [shape: f32[128,1], index: 3, kind: input, shape index: {}]   ;;  %s309_s2 = inlined_call_operand.vmem [shape: f32[1,128], index: 2, kind: input, shape index: {}]   ;;  %s310_s0 = inlined_call_operand.vmem [shape: bf16[8,128], index: 0, kind: input, shape index: {}]   ;;  %s311_s4 = inlined_call_operand.<no memory space> [shape: f32[1,1], index: 4, kind: input, shape index: {}]   ;;  %s312_s5 = inlined_call_operand.vmem [shape: f32[8,1], index: 5, kind: output, shape index: {}]  }
   0x1   :  { %v190_v0 = vld [vmem:[%s307_s1 + $0x38] sm:$0xff]  ;;  %v189_v1 = vld [vmem:[%s307_s1 + $0x30] sm:$0xff]  ;;  %v118_v4 = vld [vmem:[%s308_s3 + $0x68] sm:$0xff]  ;;  %v10_v25 = vstv %s311_s4 }
   0x2   :  { %91 = vmatpush.bf16.msra.mxu0 %v190_v0  ;;  %v120_v2 = vld [vmem:[%s308_s3 + $0x78] sm:$0xff]  ;;  %v119_v3 = vld [vmem:[%s308_s3 + $0x70] sm:$0xff]  ;;  %v188_v5 = vld [vmem:[%s307_s1 + $0x28] sm:$0xff]  ;;  %11 = vst [vmem:[#allocation2] sm:$0x1] %v10_v25 }
   0x3   :  { %125 = vmatpush.msra.mxu1 %v120_v2  ;;  %v117_v6 = vld [vmem:[%s308_s3 + $0x60] sm:$0xff]  ;;  %v116_v7 = vld [vmem:[%s308_s3 + $0x58] sm:$0xff]  ;;  %v115_v9 = vld [vmem:[%s308_s3 + $0x50] sm:$0xff] }
   0x4   :  { %v187_v8 = vld [vmem:[%s307_s1 + $0x20] sm:$0xff]  ;;  %v114_v10 = vld [vmem:[%s308_s3 + $0x48] sm:$0xff]  ;;  %v186_v11 = vld [vmem:[%s307_s1 + $0x18] sm:$0xff] }
   0x5   :  { %126 = vmatpush.msra.mxu1 %v119_v3  ;;  %v113_v12 = vld [vmem:[%s308_s3 + $0x40] sm:$0xff]  ;;  %v112_v13 = vld [vmem:[%s308_s3 + $0x38] sm:$0xff]  ;;  %v185_v14 = vld [vmem:[%s307_s1 + $0x10] sm:$0xff] }
   0x6   :  { %92 = vmatpush.bf16.msra.mxu0 %v189_v1  ;;  %v111_v15 = vld [vmem:[%s308_s3 + $0x30] sm:$0xff]  ;;  %v110_v16 = vld [vmem:[%s308_s3 + $0x28] sm:$0xff]  ;;  %v109_v18 = vld [vmem:[%s308_s3 + $0x20] sm:$0xff] }
   0x7   :  { %127 = vmatpush.msra.mxu1 %v118_v4  ;;  %v184_v17 = vld [vmem:[%s307_s1 + $0x8] sm:$0xff]  ;;  %v108_v19 = vld [vmem:[%s308_s3 + $0x18] sm:$0xff]  ;;  %v183_v20 = vld [vmem:[%s307_s1] sm:$0xff] }
   0x8   :  { %v22_v21 = vld [vmem:[%s310_s0] sm:$0xf]  ;;  %v107_v22 = vld [vmem:[%s308_s3 + $0x10] sm:$0xff]  ;;  %v106_v23 = vld [vmem:[%s308_s3 + $0x8] sm:$0xff] }
   0x9   :  { %128 = vmatpush.msra.mxu1 %v117_v6  ;;  %v105_v24 = vld [vmem:[%s308_s3] sm:$0xff] }
   0xa   :  { %93 = vmatpush.bf16.msra.mxu0 %v188_v5  ;;  %v191_v26 = vld [vmem:[%s309_s2] ss:$0 sm:$0xff] }
   0xb   :  { %129 = vmatpush.msra.mxu1 %v116_v7  ;;  %v192_v31 = vld [vmem:[#allocation2] ss:$0 sm:$0xff] }
   0xd   :  { %130 = vmatpush.msra.mxu1 %v115_v9 }
   0xe   :  { %94 = vmatpush.bf16.msra.mxu0 %v187_v8 }
   0xf   :  { %131 = vmatpush.msra.mxu1 %v114_v10 }
  0x11   :  { %132 = vmatpush.msra.mxu1 %v113_v12 }
  0x12   :  { %95 = vmatpush.bf16.msra.mxu0 %v186_v11 }
  0x13   :  { %133 = vmatpush.msra.mxu1 %v112_v13 }
  0x15   :  { %134 = vmatpush.msra.mxu1 %v111_v15 }
  0x16   :  { %96 = vmatpush.bf16.msra.mxu0 %v185_v14 }
  0x17   :  { %135 = vmatpush.msra.mxu1 %v110_v16 }
  0x19   :  { %136 = vmatpush.msra.mxu1 %v109_v18 }
  0x1a   :  { %97 = vmatpush.bf16.msra.mxu0 %v184_v17 }
  0x1b   :  { %137 = vmatpush.msra.mxu1 %v108_v19 }
  0x1d   :  { %138 = vmatpush.msra.mxu1 %v107_v22 }
  0x1e   :  { %98 = vmatpush.bf16.msra.mxu0 %v183_v20 }
  0x1f   :  { %139 = vmatpush.msra.mxu1 %v106_v23 }
  0x21   :  { %99 = vmatmul.bf16.vlgmr.msra.gmra.mxu0 %v22_v21  ;;  %140 = vmatpush.msra.mxu1 %v105_v24 }
  0x9e   :  { %v100_v27 = vpop.f32.mrf.mxu0 }
  0x9f   :  { %v101_v28 = vadd.f32 %v191_v26, %v100_v27 }
  0xa1   :  { %v104_v29 = vmax.f32 %v101_v28, 0.0 }
  0xa3   :  { %141 = vmatmul.f32.vlgmr.msra.gmra.mxu1 %v104_v29 }
  0xa6   :  { %v102_v30 = vpop.f32.mrf.mxu0 }
 0x120   :  { %v142_v32 = vpop.f32.mrf.mxu1 }
 0x121   :  { %v143_v33 = vadd.f32 %v192_v31, %v142_v32 }
 0x123   :  { %146 = vst.msk [vmem:[%s312_s5] sm:$0xff] %vm145_vm0, %v143_v33 }

</bundles_post_ra>
